<compile_context>
chip_gen: v6e
topology: v6e:2x2x1
jax: 0.10.0
libtpu: 0.0.40
codegen_flags: <defaults>
</compile_context>

<pallas_src>
import functools

import jax
import jax.numpy as jnp
from jax.experimental import pallas as pl
from jax.experimental.pallas import tpu as pltpu


# ----------------------------------------------------------------------------
# Stage 1: theta = [a0, a1, b0, b1] from batch element 0 only.
# ----------------------------------------------------------------------------
def _theta_kernel(x_ref, w1_ref, b1_ref, w2_ref, b2_ref, lam_ref, init_ref,
                  theta_ref, acc_ref, *, inv_hw):
    # x_ref: (1, chunk, C) spatial chunk of batch element 0.
    s = pl.program_id(0)

    @pl.when(s == 0)
    def _():
        acc_ref[...] = jnp.zeros_like(acc_ref)

    # Partial spatial sum for this chunk -> (1, C), accumulated across the grid.
    acc_ref[...] += jnp.sum(x_ref[0], axis=0, keepdims=True)

    @pl.when(s == pl.num_programs(0) - 1)
    def _():
        gap = acc_ref[...] * inv_hw                                    # (1, C)
        # Tiny M=1 matmuls: negligible cost either way; keep them simple.
        h = jnp.dot(gap, w1_ref[...], preferred_element_type=jnp.float32)
        h = jnp.maximum(h + b1_ref[...], 0.0)                          # fc1+relu
        y = jnp.dot(h, w2_ref[...], preferred_element_type=jnp.float32)
        y = y + b2_ref[...]                                            # fc2
        residuals = 2.0 * jax.nn.sigmoid(y) - 1.0
        theta_ref[...] = init_ref[...] + lam_ref[...] * residuals      # (1, 4)


def _compute_theta(x3d, w1t, b1, w2t, b2, lam, init, *, chunk):
    """x3d: (B, H*W, C).  Returns theta as a flat (4,) f32 array."""
    B, HW, C = x3d.shape
    R = w1t.shape[1]
    n_chunks = HW // chunk
    kernel = functools.partial(_theta_kernel, inv_hw=1.0 / float(HW))
    theta = pl.pallas_call(
        kernel,
        out_shape=jax.ShapeDtypeStruct((1, 4), jnp.float32),
        grid=(n_chunks,),
        in_specs=[
            # Only batch element 0 is ever read; stream it in spatial chunks.
            pl.BlockSpec((1, chunk, C), lambda s: (0, s, 0)),
            pl.BlockSpec((C, R), lambda s: (0, 0)),
            pl.BlockSpec((1, R), lambda s: (0, 0)),
            pl.BlockSpec((R, 4), lambda s: (0, 0)),
            pl.BlockSpec((1, 4), lambda s: (0, 0)),
            pl.BlockSpec((1, 4), lambda s: (0, 0)),
            pl.BlockSpec((1, 4), lambda s: (0, 0)),
        ],
        out_specs=pl.BlockSpec((1, 4), lambda s: (0, 0)),
        scratch_shapes=[pltpu.VMEM((1, C), jnp.float32)],
        compiler_params=pltpu.CompilerParams(
            dimension_semantics=("arbitrary",)),   # reduction axis, accumulator
    )(x3d, w1t, b1, w2t, b2, lam, init)
    return theta.reshape(4)


# ----------------------------------------------------------------------------
# Stage 2: element-wise max(a0*x + b0, a1*x + b1) over the full tensor.
# ----------------------------------------------------------------------------
def _apply_kernel(theta_ref, x_ref, o_ref):
    # theta_ref: SMEM (4,) = [a0, a1, b0, b1]
    a0 = theta_ref[0]
    a1 = theta_ref[1]
    b0 = theta_ref[2]
    b1 = theta_ref[3]
    x = x_ref[...]
    o_ref[...] = jnp.maximum(a0 * x + b0, a1 * x + b1)


def _apply_dyrelu(x, theta, *, lanes=512, tile_rows=1024):
    """Lane-dense flattened tiling of the element-wise stage."""
    orig_shape = x.shape
    total = x.size

    # Pick a lane width that is a multiple of 128 (prefer 512).
    L = lanes
    while L > 128 and total % L != 0:
        L //= 2
    rows = -(-total // L)                      # ceil-div
    if rows <= tile_rows:
        tile_rows = rows                       # single block == full dims (legal)
        pad_rows = rows
    else:
        pad_rows = -(-rows // tile_rows) * tile_rows   # tile_rows is a mult. of 8
    padded_total = pad_rows * L

    flat = x.reshape(-1)
    if padded_total != total:
        flat = jnp.pad(flat, (0, padded_total - total))
    x2d = flat.reshape(pad_rows, L)

    grid = pad_rows // tile_rows               # many even "parallel" steps
    out2d = pl.pallas_call(
        _apply_kernel,
        out_shape=jax.ShapeDtypeStruct((pad_rows, L), x.dtype),
        grid=(grid,),
        in_specs=[
            pl.BlockSpec(memory_space=pltpu.MemorySpace.SMEM),   # theta scalars
            pl.BlockSpec((tile_rows, L), lambda i: (i, 0)),
        ],
        out_specs=pl.BlockSpec((tile_rows, L), lambda i: (i, 0)),
        compiler_params=pltpu.CompilerParams(
            dimension_semantics=("parallel",),
            vmem_limit_bytes=32 * 1024 * 1024,   # safe on v5e/v6e/v7x; ~8 MiB used
        ),
    )(theta, x2d)

    out = out2d.reshape(-1)
    if padded_total != total:
        out = out[:total]
    return out.reshape(orig_shape)


# ----------------------------------------------------------------------------
# Public wrapper (semantics of TaskAwareLayer.forward on NHWC input).
# ----------------------------------------------------------------------------
def task_aware_layer(x, params):
    """x: (B, H, W, C) float32 NHWC (same layout TaskAwareLayer.forward gets)."""
    B, H, W, C = x.shape
    w1t, b1, w2t, b2, lambdas, init_values = params

    # ---- stage 1: theta from batch element 0 (chunked GAP + tiny FCs) ----
    hw = H * W
    chunk = hw                                      # fallback: whole extent
    budget = max(8, (512 * 1024) // max(C, 1))      # ~2 MiB f32 per GAP block
    for cand in (4096, 2048, 1024, 512, 256, 128, 64, 32, 16, 8):
        if cand <= budget and cand <= hw and hw % cand == 0:
            chunk = cand
            break
    x3d = x.reshape(B, hw, C)                       # contiguous reshape (cheap)
    theta = _compute_theta(x3d, w1t, b1, w2t, b2, lambdas, init_values,
                           chunk=chunk)

    # ---- stage 2: lane-dense element-wise apply over the full tensor ----
    # TODO(synk): optionally cast x/out to bf16 at this boundary (v6e/v7x) if
    # the surrounding model tolerates bf16 activations; kept f32 for parity.
    return _apply_dyrelu(x, theta)


def reference(x, w1, b1, w2, b2, lambdas, init_values):
    """Pure-JAX reference mirroring the PyTorch forward (NHWC input)."""
    gap = jnp.mean(x, axis=(1, 2))                    # (B, C) == avg_pool+flatten
    h = jax.nn.relu(gap @ w1.T + b1)                  # fc1 + relu
    y = h @ w2.T + b2                                 # fc2
    residuals = 2.0 * jax.nn.sigmoid(y) - 1.0
    theta = init_values + lambdas * residuals         # (B, 4)
    a0, a1, bb0, bb1 = theta[0, 0], theta[0, 1], theta[0, 2], theta[0, 3]
    return jnp.maximum(a0 * x + bb0, a1 * x + bb1)


if __name__ == "__main__":
    key = jax.random.PRNGKey(0)
    kx, k1, k2, k3, k4 = jax.random.split(key, 5)

    B, H, W, C = 2, 16, 16, 32          # channels must be >= reduction (8)
    R = C // 8                           # fc1 output dim
    K2 = 4                               # 2 * k

    # deterministic synthetic parameters (PyTorch Linear stores weight as (out, in))
    w1 = jax.random.normal(k1, (R, C), jnp.float32) * 0.1
    b1 = jax.random.normal(k2, (R,), jnp.float32) * 0.1
    w2 = jax.random.normal(k3, (K2, R), jnp.float32) * 0.1
    b2 = jax.random.normal(k4, (K2,), jnp.float32) * 0.1
    lambdas = jnp.array([1.0, 1.0, 0.5, 0.5], jnp.float32)
    init_values = jnp.array([1.0, 0.0, 0.0, 0.0], jnp.float32)

    x = jax.random.normal(kx, (B, H, W, C), jnp.float32)   # NHWC input

    params = (
        w1.T,                      # (C, R)
        b1.reshape(1, R),          # (1, R)
        w2.T,                      # (R, 4)
        b2.reshape(1, K2),         # (1, 4)
        lambdas.reshape(1, 4),
        init_values.reshape(1, 4),
    )

    out = jax.block_until_ready(task_aware_layer(x, params))
    ref = jax.block_until_ready(reference(x, w1, b1, w2, b2, lambdas, init_values))

    assert out.shape == x.shape and out.dtype == x.dtype
    assert jnp.allclose(out, ref, rtol=2e-2, atol=2e-2), "mismatch vs reference"
    print("KERNEL_OK")
</pallas_src>

<mosaic_0001>
module attributes {stable_mosaic.version = 11 : i64} {
  func.func @_theta_kernel(%arg0: i32, %arg1: memref<1x256x32xf32, #tpu.memory_space<vmem>>, %arg2: memref<32x4xf32, #tpu.memory_space<vmem>>, %arg3: memref<1x4xf32, #tpu.memory_space<vmem>>, %arg4: memref<4x4xf32, #tpu.memory_space<vmem>>, %arg5: memref<1x4xf32, #tpu.memory_space<vmem>>, %arg6: memref<1x4xf32, #tpu.memory_space<vmem>>, %arg7: memref<1x4xf32, #tpu.memory_space<vmem>>, %arg8: memref<1x4xf32, #tpu.memory_space<vmem>>, %arg9: memref<1x32xf32, #tpu.memory_space<vmem>>) attributes {dimension_semantics = [#tpu.dimension_semantics<arbitrary>], iteration_bounds = array<i64: 1>, scalar_prefetch = 0 : i64, scratch_operands = 1 : i64, tpu.core_type = #tpu.core_type<tc>, window_params = [{transform_indices = @transform_0, window_bounds = array<i64: 1, 256, 32>}, {pipeline_mode = #tpu.pipeline_mode<synchronous>, transform_indices = @transform_1, window_bounds = array<i64: 32, 4>}, {pipeline_mode = #tpu.pipeline_mode<synchronous>, transform_indices = @transform_2, window_bounds = array<i64: 1, 4>}, {pipeline_mode = #tpu.pipeline_mode<synchronous>, transform_indices = @transform_3, window_bounds = array<i64: 4, 4>}, {pipeline_mode = #tpu.pipeline_mode<synchronous>, transform_indices = @transform_4, window_bounds = array<i64: 1, 4>}, {pipeline_mode = #tpu.pipeline_mode<synchronous>, transform_indices = @transform_5, window_bounds = array<i64: 1, 4>}, {pipeline_mode = #tpu.pipeline_mode<synchronous>, transform_indices = @transform_6, window_bounds = array<i64: 1, 4>}, {pipeline_mode = #tpu.pipeline_mode<synchronous>, transform_indices = @transform_7, window_bounds = array<i64: 1, 4>}]} {
    %c0_i32 = arith.constant 0 : i32
    %0 = arith.cmpi eq, %arg0, %c0_i32 : i32
    %1 = arith.extui %0 : i1 to i32
    %c0_i32_0 = arith.constant 0 : i32
    %2 = arith.cmpi ne, %1, %c0_i32_0 : i32
    scf.if %2 {
      %cst_9 = arith.constant 0.000000e+00 : f32
      %13 = vector.broadcast %cst_9 : f32 to vector<1x32xf32>
      %c0_10 = arith.constant 0 : index
      %c0_11 = arith.constant 0 : index
      %14 = vector.load %arg9[%c0_10, %c0_11] : memref<1x32xf32, #tpu.memory_space<vmem>>, vector<1x32xf32>
      tpu.vector_store %arg9[%c0_10, %c0_11], %13 {strides = array<i32>} : memref<1x32xf32, #tpu.memory_space<vmem>>, vector<1x32xf32>,
    } else {
    }
    %c0 = arith.constant 0 : index
    %c0_1 = arith.constant 0 : index
    %3 = vector.load %arg9[%c0, %c0_1] : memref<1x32xf32, #tpu.memory_space<vmem>>, vector<1x32xf32>
    %c0_2 = arith.constant 0 : index
    %c0_3 = arith.constant 0 : index
    %c0_4 = arith.constant 0 : index
    %4 = vector.load %arg1[%c0_2, %c0_3, %c0_4] : memref<1x256x32xf32, #tpu.memory_space<vmem>>, vector<1x256x32xf32>
    %5 = vector.shape_cast %4 : vector<1x256x32xf32> to vector<256x32xf32>
    %cst = arith.constant dense<0.000000e+00> : vector<32xf32>
    %6 = vector.multi_reduction <add>, %5, %cst [0] : vector<256x32xf32> to vector<32xf32>
    %7 = vector.shape_cast %6 : vector<32xf32> to vector<1x32xf32>
    %8 = arith.addf %3, %7 : vector<1x32xf32>
    %c0_5 = arith.constant 0 : index
    %c0_6 = arith.constant 0 : index
    %9 = vector.load %arg9[%c0_5, %c0_6] : memref<1x32xf32, #tpu.memory_space<vmem>>, vector<1x32xf32>
    tpu.vector_store %arg9[%c0_5, %c0_6], %8 {strides = array<i32>} : memref<1x32xf32, #tpu.memory_space<vmem>>, vector<1x32xf32>,
    %c0_i32_7 = arith.constant 0 : i32
    %10 = arith.cmpi eq, %arg0, %c0_i32_7 : i32
    %11 = arith.extui %10 : i1 to i32
    %c0_i32_8 = arith.constant 0 : i32
    %12 = arith.cmpi ne, %11, %c0_i32_8 : i32
    scf.if %12 {
      %c0_9 = arith.constant 0 : index
      %c0_10 = arith.constant 0 : index
      %13 = vector.load %arg9[%c0_9, %c0_10] : memref<1x32xf32, #tpu.memory_space<vmem>>, vector<1x32xf32>
      %cst_11 = arith.constant 3.906250e-03 : f32
      %14 = vector.broadcast %cst_11 : f32 to vector<1x32xf32>
      %15 = arith.mulf %13, %14 : vector<1x32xf32>
      %c0_12 = arith.constant 0 : index
      %c0_13 = arith.constant 0 : index
      %16 = vector.load %arg2[%c0_12, %c0_13] : memref<32x4xf32, #tpu.memory_space<vmem>>, vector<32x4xf32>
      %cst_14 = arith.constant dense<0.000000e+00> : vector<1x4xf32>
      %17 = tpu.matmul %15, %16, %cst_14 {dimension_numbers = #tpu.dot_dimension_numbers<[1], [0], [0], [1], [0, 0, 1, 1], [], []>} : vector<1x32xf32>, vector<32x4xf32>, vector<1x4xf32> -> vector<1x4xf32>
      %c0_15 = arith.constant 0 : index
      %c0_16 = arith.constant 0 : index
      %18 = vector.load %arg3[%c0_15, %c0_16] : memref<1x4xf32, #tpu.memory_space<vmem>>, vector<1x4xf32>
      %19 = arith.addf %17, %18 : vector<1x4xf32>
      %cst_17 = arith.constant 0.000000e+00 : f32
      %20 = vector.broadcast %cst_17 : f32 to vector<1x4xf32>
      %21 = arith.maximumf %19, %20 : vector<1x4xf32>
      %c0_18 = arith.constant 0 : index
      %c0_19 = arith.constant 0 : index
      %22 = vector.load %arg4[%c0_18, %c0_19] : memref<4x4xf32, #tpu.memory_space<vmem>>, vector<4x4xf32>
      %cst_20 = arith.constant dense<0.000000e+00> : vector<1x4xf32>
      %23 = tpu.matmul %21, %22, %cst_20 {dimension_numbers = #tpu.dot_dimension_numbers<[1], [0], [0], [1], [0, 0, 1, 1], [], []>} : vector<1x4xf32>, vector<4x4xf32>, vector<1x4xf32> -> vector<1x4xf32>
      %c0_21 = arith.constant 0 : index
      %c0_22 = arith.constant 0 : index
      %24 = vector.load %arg5[%c0_21, %c0_22] : memref<1x4xf32, #tpu.memory_space<vmem>>, vector<1x4xf32>
      %25 = arith.addf %23, %24 : vector<1x4xf32>
      %26 = arith.negf %25 : vector<1x4xf32>
      %27 = math.exp %26 : vector<1x4xf32>
      %cst_23 = arith.constant 1.000000e+00 : f32
      %28 = vector.broadcast %cst_23 : f32 to vector<1x4xf32>
      %29 = arith.addf %28, %27 : vector<1x4xf32>
      %30 = arith.divf %28, %29 : vector<1x4xf32>
      %cst_24 = arith.constant 2.000000e+00 : f32
      %31 = vector.broadcast %cst_24 : f32 to vector<1x4xf32>
      %32 = arith.mulf %31, %30 : vector<1x4xf32>
      %cst_25 = arith.constant 1.000000e+00 : f32
      %33 = vector.broadcast %cst_25 : f32 to vector<1x4xf32>
      %34 = arith.subf %32, %33 : vector<1x4xf32>
      %c0_26 = arith.constant 0 : index
      %c0_27 = arith.constant 0 : index
      %35 = vector.load %arg7[%c0_26, %c0_27] : memref<1x4xf32, #tpu.memory_space<vmem>>, vector<1x4xf32>
      %c0_28 = arith.constant 0 : index
      %c0_29 = arith.constant 0 : index
      %36 = vector.load %arg6[%c0_28, %c0_29] : memref<1x4xf32, #tpu.memory_space<vmem>>, vector<1x4xf32>
      %37 = arith.mulf %36, %34 : vector<1x4xf32>
      %38 = arith.addf %35, %37 : vector<1x4xf32>
      %c0_30 = arith.constant 0 : index
      %c0_31 = arith.constant 0 : index
      %39 = vector.load %arg8[%c0_30, %c0_31] : memref<1x4xf32, #tpu.memory_space<vmem>>, vector<1x4xf32>
      tpu.vector_store %arg8[%c0_30, %c0_31], %38 {strides = array<i32>} : memref<1x4xf32, #tpu.memory_space<vmem>>, vector<1x4xf32>,
    } else {
    }
    return
  }
  func.func @transform_0(%arg0: i32) -> (i32, i32, i32) {
    %c0_i32 = arith.constant 0 : i32
    %c0_i32_0 = arith.constant 0 : i32
    %c0_i32_1 = arith.constant 0 : i32
    return %c0_i32, %arg0, %c0_i32_0 : i32, i32, i32
  }
  func.func @transform_1(%arg0: i32) -> (i32, i32) {
    %c0_i32 = arith.constant 0 : i32
    %c0_i32_0 = arith.constant 0 : i32
    %c0_i32_1 = arith.constant 0 : i32
    return %c0_i32, %c0_i32_0 : i32, i32
  }
  func.func @transform_2(%arg0: i32) -> (i32, i32) {
    %c0_i32 = arith.constant 0 : i32
    %c0_i32_0 = arith.constant 0 : i32
    %c0_i32_1 = arith.constant 0 : i32
    return %c0_i32, %c0_i32_0 : i32, i32
  }
  func.func @transform_3(%arg0: i32) -> (i32, i32) {
    %c0_i32 = arith.constant 0 : i32
    %c0_i32_0 = arith.constant 0 : i32
    %c0_i32_1 = arith.constant 0 : i32
    return %c0_i32, %c0_i32_0 : i32, i32
  }
  func.func @transform_4(%arg0: i32) -> (i32, i32) {
    %c0_i32 = arith.constant 0 : i32
    %c0_i32_0 = arith.constant 0 : i32
    %c0_i32_1 = arith.constant 0 : i32
    return %c0_i32, %c0_i32_0 : i32, i32
  }
  func.func @transform_5(%arg0: i32) -> (i32, i32) {
    %c0_i32 = arith.constant 0 : i32
    %c0_i32_0 = arith.constant 0 : i32
    %c0_i32_1 = arith.constant 0 : i32
    return %c0_i32, %c0_i32_0 : i32, i32
  }
  func.func @transform_6(%arg0: i32) -> (i32, i32) {
    %c0_i32 = arith.constant 0 : i32
    %c0_i32_0 = arith.constant 0 : i32
    %c0_i32_1 = arith.constant 0 : i32
    return %c0_i32, %c0_i32_0 : i32, i32
  }
  func.func @transform_7(%arg0: i32) -> (i32, i32) {
    %c0_i32 = arith.constant 0 : i32
    %c0_i32_0 = arith.constant 0 : i32
    %c0_i32_1 = arith.constant 0 : i32
    return %c0_i32, %c0_i32_0 : i32, i32
  }
}

</mosaic_0001>

<bundles_post_ra>
// kernel: tpu_custom_call.1
= control target key start
LH: loop header
LB: loop body
LE: loop exit
PB: predicated region body
PF: predicated region fallthrough
CT: control target
= control target key end

     0   :  { %vm31_vm0 = vcmask 253952   ;;  %vm66_vm1 = vcmask 261120   ;;  %v388_v3 = vmov 0.0   ;;  %s592_s0 = inlined_call_operand.vmem [shape: f32[2,256,32], index: 0, kind: input, shape index: {}]   ;;  %s593_s1 = inlined_call_operand.vmem [shape: f32[32,4], index: 1, kind: input, shape index: {}]   ;;  %s594_s2 = inlined_call_operand.vmem [shape: f32[1,4], index: 2, kind: input, shape index: {}]   ;;  %s595_s3 = inlined_call_operand.vmem [shape: f32[4,4], index: 3, kind: input, shape index: {}]   ;;  %s596_s4 = inlined_call_operand.vmem [shape: f32[1,4], index: 4, kind: input, shape index: {}]   ;;  %s597_s5 = inlined_call_operand.vmem [shape: f32[1,4], index: 5, kind: input, shape index: {}]   ;;  %s598_s6 = inlined_call_operand.vmem [shape: f32[1,4], index: 6, kind: input, shape index: {}]   ;;  %s599_s7 = inlined_call_operand.hbm [shape: f32[1,4], index: 7, kind: output, shape index: {}]  }
   0x1   :  { %v34_v0 = vld [vmem:[%s592_s0] sm:$0xff]  ;;  %v35_v1 = vld [vmem:[%s592_s0 + $0x8] sm:$0xff]  ;;  %v36_v2 = vld [vmem:[%s592_s0 + $0x10] sm:$0xff]  ;;  %32 = vst.msk [vmem:[#allocation2] sm:$0x1] %vm31_vm0, %v388_v3  ;;  %343 = vmatprep.subr.mxu0 %v388_v3  ;;  %354 = vmatprep.subr.mxu1 %v388_v3 }
   0x2   :  { %v37_v4 = vld [vmem:[%s592_s0 + $0x18] sm:$0xff]  ;;  %v67_v5 = vsel %vm66_vm1, %v34_v0, 0.0  ;;  %v68_v6 = vsel %vm66_vm1, %v35_v1, 0.0  ;;  %v70_v7 = vsel %vm66_vm1, %v36_v2, 0.0  ;;  %v38_v8 = vld [vmem:[%s592_s0 + $0x20] sm:$0xff]  ;;  %v39_v11 = vld [vmem:[%s592_s0 + $0x28] sm:$0xff] }
   0x3   :  { %v69_v9 = vadd.f32 %v68_v6, %v67_v5  ;;  %v72_v10 = vsel %vm66_vm1, %v37_v4, 0.0  ;;  %v74_v13 = vsel %vm66_vm1, %v38_v8, 0.0  ;;  %v40_v14 = vld [vmem:[%s592_s0 + $0x30] sm:$0xff]  ;;  %v76_v16 = vsel %vm66_vm1, %v39_v11, 0.0  ;;  %v41_v17 = vld [vmem:[%s592_s0 + $0x38] sm:$0xff]  ;;  %v42_v20 = vld [vmem:[%s592_s0 + $0x40] sm:$0xff] }
   0x4   :  { %v78_v19 = vsel %vm66_vm1, %v40_v14, 0.0  ;;  %v80_v22 = vsel %vm66_vm1, %v41_v17, 0.0  ;;  %v147_v23 = vld [vmem:[%s593_s1 + $0x18] sm:$0xff]  ;;  %v146_v24 = vld [vmem:[%s593_s1 + $0x10] sm:$0xff]  ;;  %v43_v25 = vld [vmem:[%s592_s0 + $0x48] sm:$0xff] }
   0x5   :  { %v71_v12 = vadd.f32 %v70_v7, %v69_v9  ;;  %344 = vmatpush3.msra.mxu0 %v147_v23 }
   0x7   :  { %v73_v15 = vadd.f32 %v72_v10, %v71_v12 }
   0x9   :  { %v75_v18 = vadd.f32 %v74_v13, %v73_v15 }
   0xb   :  { %v77_v21 = vadd.f32 %v76_v16, %v75_v18 }
   0xd   :  { %v79_v26 = vadd.f32 %v78_v19, %v77_v21 }
   0xe   :  { %12 = vsyncpa [#allocation4], 0  ;;  %v82_v27 = vsel %vm66_vm1, %v42_v20, 0.0  ;;  %345 = vmatprep.subr.mxu0 %v388_v3  ;;  %v145_v28 = vld [vmem:[%s593_s1 + $0x8] sm:$0xff]  ;;  %vm389_vm2 = vmmov 0   ;;  %v44_v29 = vld [vmem:[%s592_s0 + $0x50] sm:$0xff] }
   0xf   :  { %351 = vmatprep.mubr.msk.f32.mxu0 %vm389_vm2, %v388_v3  ;;  %v81_v30 = vadd.f32 %v80_v22, %v79_v26  ;;  %346 = vmatpush3.msra.mxu0 %v146_v24  ;;  %v84_v31 = vsel %vm66_vm1, %v43_v25, 0.0  ;;  %v144_v32 = vld [vmem:[%s593_s1] sm:$0xff]  ;;  %v45_v33 = vld [vmem:[%s592_s0 + $0x58] sm:$0xff]  ;;  %v86_v35 = vsel %vm66_vm1, %v44_v29, 0.0  ;;  %v47_v39 = vld [vmem:[%s592_s0 + $0x68] sm:$0xff]  ;;  %vm229_vm3 = vcmask 1043456  }
  0x10   :  { %356 = vmatprep.mubr.msk.f32.mxu1 %vm389_vm2, %v388_v3  ;;  %347 = vmatprep.subr.mxu0 %v388_v3  ;;  %v46_v36 = vld [vmem:[%s592_s0 + $0x60] sm:$0xff]  ;;  %v88_v38 = vsel %vm66_vm1, %v45_v33, 0.0  ;;  %v48_v42 = vld [vmem:[%s592_s0 + $0x70] sm:$0xff]  ;;  %v92_v44 = vsel %vm66_vm1, %v47_v39, 0.0  ;;  %v49_v45 = vld [vmem:[%s592_s0 + $0x78] sm:$0xff]  ;;  %vm225_vm4 = vcmask 31744  }
  0x11   :  { %v83_v34 = vadd.f32 %v82_v27, %v81_v30  ;;  %348 = vmatpush3.msra.mxu0 %v145_v28  ;;  %v90_v41 = vsel %vm66_vm1, %v46_v36, 0.0  ;;  %v94_v47 = vsel %vm66_vm1, %v48_v42, 0.0  ;;  %v50_v48 = vld [vmem:[%s592_s0 + $0x80] sm:$0xff]  ;;  %v96_v50 = vsel %vm66_vm1, %v49_v45, 0.0  ;;  %v51_v51 = vld [vmem:[%s592_s0 + $0x88] sm:$0xff]  ;;  %v52_v54 = vld [vmem:[%s592_s0 + $0x90] sm:$0xff] }
  0x12   :  { %349 = vmatprep.subr.mxu0 %v388_v3  ;;  %v98_v53 = vsel %vm66_vm1, %v50_v48, 0.0  ;;  %v100_v56 = vsel %vm66_vm1, %v51_v51, 0.0  ;;  %v53_v57 = vld [vmem:[%s592_s0 + $0x98] sm:$0xff]  ;;  %v102_v59 = vsel %vm66_vm1, %v52_v54, 0.0  ;;  %v54_v60 = vld [vmem:[%s592_s0 + $0xa0] sm:$0xff]  ;;  %v55_v63 = vld [vmem:[%s592_s0 + $0xa8] sm:$0xff] }
  0x13   :  { %v85_v37 = vadd.f32 %v84_v31, %v83_v34  ;;  %350 = vmatpush3.msra.mxu0 %v144_v32  ;;  %v104_v62 = vsel %vm66_vm1, %v53_v57, 0.0  ;;  %v106_v1 = vsel %vm66_vm1, %v54_v60, 0.0  ;;  %v56_v2 = vld [vmem:[%s592_s0 + $0xb0] sm:$0xff]  ;;  %v108_v4 = vsel %vm66_vm1, %v55_v63, 0.0  ;;  %v57_v5 = vld [vmem:[%s592_s0 + $0xb8] sm:$0xff]  ;;  %v58_v8 = vld [vmem:[%s592_s0 + $0xc0] sm:$0xff] }
  0x14   :  { %v110_v7 = vsel %vm66_vm1, %v56_v2, 0.0  ;;  %v112_v10 = vsel %vm66_vm1, %v57_v5, 0.0  ;;  %v59_v11 = vld [vmem:[%s592_s0 + $0xc8] sm:$0xff]  ;;  %v114_v13 = vsel %vm66_vm1, %v58_v8, 0.0  ;;  %v60_v14 = vld [vmem:[%s592_s0 + $0xd0] sm:$0xff]  ;;  %v61_v17 = vld [vmem:[%s592_s0 + $0xd8] sm:$0xff] }
  0x15   :  { %v87_v40 = vadd.f32 %v86_v35, %v85_v37  ;;  %v116_v16 = vsel %vm66_vm1, %v59_v11, 0.0  ;;  %v118_v19 = vsel %vm66_vm1, %v60_v14, 0.0  ;;  %v62_v20 = vld [vmem:[%s592_s0 + $0xe0] sm:$0xff]  ;;  %v120_v22 = vsel %vm66_vm1, %v61_v17, 0.0  ;;  %v63_v23 = vld [vmem:[%s592_s0 + $0xe8] sm:$0xff]  ;;  %v64_v26 = vld [vmem:[%s592_s0 + $0xf0] sm:$0xff] }
  0x16   :  { %v122_v25 = vsel %vm66_vm1, %v62_v20, 0.0  ;;  %v124_v28 = vsel %vm66_vm1, %v63_v23, 0.0  ;;  %v65_v29 = vld [vmem:[%s592_s0 + $0xf8] sm:$0xff]  ;;  %v126_v31 = vsel %vm66_vm1, %v64_v26, 0.0  ;;  %v311_v63 = vld [vmem:[%s598_s6] sm:$0x1] }
  0x17   :  { %v89_v43 = vadd.f32 %v88_v38, %v87_v40  ;;  %v128_v33 = vsel %vm66_vm1, %v65_v29, 0.0  ;;  %vm315_vm5 = vcmask 24576  }
  0x19   :  { %v91_v46 = vadd.f32 %v90_v41, %v89_v43  ;;  %v33_v41 = vld [vmem:[#allocation2] sm:$0x1] }
  0x1b   :  { %v93_v49 = vadd.f32 %v92_v44, %v91_v46  ;;  %v223_v46 = vld [vmem:[%s595_s3] sm:$0xf] }
  0x1c   :  { %355 = vmatpush3.msk.msra.mxu1 %vm229_vm3, %v223_v46 }
  0x1d   :  { %v95_v52 = vadd.f32 %v94_v47, %v93_v49  ;;  %v148_v47 = vld [vmem:[%s594_s2] sm:$0x1] }
  0x1f   :  { %v97_v55 = vadd.f32 %v96_v50, %v95_v52  ;;  %v224_v52 = vld [vmem:[%s596_s4] sm:$0x1]  ;;  %s390_s4 = smov [#allocation3]  }
  0x20   :  { %s323_s9 = sshll.u32 %s390_s4, 4  ;;  %s324_s9 = int_to_ptr.vmem [resolvable:$true] %s323_s9 }
  0x21   :  { %v99_v58 = vadd.f32 %v98_v53, %v97_v55  ;;  %s366_s10 = scalar_lea.vmem %s324_s9, 16  ;;  %s370_s11 = scalar_lea.vmem %s324_s9, 32 }
  0x22   :  { %p367_p0 = scmp.ne.s32.totalorder %s324_s9, %s366_s10  ;;  %p371_p1 = scmp.lt.s32.totalorder %s324_s9, %s324_s9 }
  0x23   :  { %v101_v61 = vadd.f32 %v100_v56, %v99_v58  ;;  %p372_p2 = scmp.lt.s32.totalorder %s370_s11, %s366_s10 }
  0x25   :  { %v103_v0 = vadd.f32 %v102_v59, %v101_v61  ;;  %v312_v61 = vld [vmem:[%s597_s5] sm:$0x1]  ;;  %p373_p3 = por %p372_p2, %p371_p1 }
  0x27   :  { %v105_v3 = vadd.f32 %v104_v62, %v103_v0  ;;  %p374_p4 = pnand %p373_p3, %p367_p0 }
  0x29   :  { %v107_v6 = vadd.f32 %v106_v1, %v105_v3 }
  0x2b   :  { %v109_v9 = vadd.f32 %v108_v4, %v107_v6 }
  0x2d   :  { %v111_v12 = vadd.f32 %v110_v7, %v109_v9 }
  0x2f   :  { %v113_v15 = vadd.f32 %v112_v10, %v111_v12 }
  0x31   :  { %v115_v18 = vadd.f32 %v114_v13, %v113_v15 }
  0x33   :  { %v117_v21 = vadd.f32 %v116_v16, %v115_v18 }
  0x35   :  { %v119_v24 = vadd.f32 %v118_v19, %v117_v21 }
  0x37   :  { %v121_v27 = vadd.f32 %v120_v22, %v119_v24 }
  0x39   :  { %v123_v30 = vadd.f32 %v122_v25, %v121_v27 }
  0x3b   :  { %v125_v32 = vadd.f32 %v124_v28, %v123_v30 }
  0x3d   :  { %v127_v34 = vadd.f32 %v126_v31, %v125_v32 }
  0x3f   :  { %v129_v35 = vadd.f32 %v128_v33, %v127_v34 }
  0x41   :  { %v130_v36 = vrot.slane %v129_v35, 4 }
  0x43   :  { %v131_v37 = vadd.f32 %v130_v36, %v129_v35 }
  0x45   :  { %v132_v38 = vrot.slane %v131_v37, 2 }
  0x47   :  { %v133_v39 = vadd.f32 %v132_v38, %v131_v37 }
  0x49   :  { %v134_v40 = vrot.slane %v133_v39, 1 }
  0x4b   :  { %v135_v42 = vadd.f32 %v134_v40, %v133_v39 }
  0x4d   :  { %v136_v43 = vadd.f32 %v135_v42, %v33_v41 }
  0x4f   :  { %138 = vst.msk [vmem:[#allocation2] sm:$0x1] %vm31_vm0, %v136_v43 }
  0x56   :  { %v142_v44 = vld [vmem:[#allocation2] sm:$0x1] }
  0x57   :  { %v143_v45 = vmul.f32 0.00390625, %v142_v44 }
  0x59   :  { %352 = vmatmul.mubr.msk.f32.vlgmr.msra.gmra.mxu0 %vm66_vm1, %v143_v45 }
 0x119   :  { %v218_v48 = vpop.f32.mrf.mxu0 }
 0x11a   :  { %v219_v49 = vadd.f32 %v218_v48, %v148_v47 }
 0x11b   :  { %v353_v50 = vpop.f32.mrf.mxu0 }
 0x11c   :  { %v222_v51 = vmax.f32 %v219_v49, 0.0 }
 0x11e   :  { %357 = vmatmul.mubr.msk.f32.vlgmr.msra.gmra.mxu1 %vm225_vm4, %v222_v51 }
 0x1de   :  { %v299_v53 = vpop.f32.mrf.mxu1 }
 0x1df   :  { %v300_v54 = vadd.f32 %v299_v53, %v224_v52 }
 0x1e0   :  { %v358_v55 = vpop.f32.mrf.mxu1 }
 0x1e1   :  { %v334_v56 = vmul.f32 -1.442695, %v300_v54 }
 0x1e3   :  { %362 = vpow2.f32 %v334_v56 }
 0x1f0   :  { %v363_v57 = vpop.eup %362 }
 0x1f1   :  { %v306_v58 = vadd.f32 1.0, %v363_v57 }
 0x1f3   :  { %364 = vrcp.f32 %v306_v58 }
 0x200   :  { %v365_v59 = vpop.eup %364 }
 0x201   :  { %v309_v60 = vmul.f32 2.0, %v365_v59 }
 0x203   :  { %v335_v62 = vadd.f32 -1.0, %v309_v60 }
 0x205   :  { %v313_v0 = vmul.f32 %v335_v62, %v312_v61 }
 0x207   :  { %v314_v1 = vadd.f32 %v313_v0, %v311_v63 }
 0x209   :  { %316 = vst.msk [vmem:[#allocation3] sm:$0x1] %vm315_vm5, %v314_v1 }
 0x20a   :  { %377 = shalt.err (!%p374_p4)
}
 0x20b   :  { %326 = dma.vmem_to_hbm [thread:$0]  %s324_s9, 16, %s599_s7, [#allocation4]  }
 0x20c   :  { %386 = dma.done.wait [#allocation4], 16  }
 0x20d   :  { %387 = vsyncadd [#allocation4], 4294967280 }
 0x20e   :  { %330 = vsyncpa [#allocation4], 1 }

</bundles_post_ra>
